<compile_context>
chip_gen: v7x
topology: tpu7x:2x2x1
jax: 0.10.0
libtpu: 0.0.40
codegen_flags: <defaults>
</compile_context>

<pallas_src>
import functools

import jax
import jax.numpy as jnp
from jax.experimental import pallas as pl
from jax.experimental.pallas import tpu as pltpu

_MiB = 1024 * 1024


def _head_kernel(x_ref, w_ref, b_ref, o_ref, acc_ref, *, n_valid, tok_tile):
    # x_ref: (tB, tN, E) streamed tile of the FULL x (dropped token masked here)
    # w_ref: (E, Cpad) resident, gamma folded in, x.dtype
    # b_ref: (1, Cpad) resident, beta folded in, f32
    # o_ref: (tB, Cpad) lane-dense padded output
    # acc_ref: (tB, E) f32 token-sum accumulator (VMEM scratch)
    k = pl.program_id(1)
    tile_start = k * tok_tile

    @pl.when(k == 0)
    def _init():
        acc_ref[...] = jnp.zeros_like(acc_ref)

    # Fully-valid token tiles: cheap unmasked sum, accumulated in f32.
    @pl.when(tile_start + tok_tile <= n_valid)
    def _full_tile():
        acc_ref[...] += jnp.sum(x_ref[...].astype(jnp.float32), axis=1)

    # Tile containing the dropped last token (and/or OOB padding): mask it with a
    # cheap (tN, 1) iota broadcast over E (no tN x E int32 materialization).
    @pl.when(tile_start + tok_tile > n_valid)
    def _masked_tile():
        xf = x_ref[...].astype(jnp.float32)
        tok = jax.lax.broadcasted_iota(jnp.int32, (tok_tile, 1), 0)   # (tN, 1)
        mask = (tile_start + tok) < n_valid                           # (tN, 1)
        xm = jnp.where(mask[None, :, :], xf, jnp.zeros_like(xf))
        acc_ref[...] += jnp.sum(xm, axis=1)

    # Finalize once per batch tile: mean, LayerNorm (affine folded into W'/b'),
    # Linear on the MXU, lane-dense store.
    @pl.when(k == pl.num_programs(1) - 1)
    def _finalize():
        pooled = acc_ref[...] * jnp.float32(1.0 / n_valid)            # (tB, E)
        mu = jnp.mean(pooled, axis=-1, keepdims=True)
        var = jnp.mean((pooled - mu) ** 2, axis=-1, keepdims=True)
        normed = (pooled - mu) * jax.lax.rsqrt(var + jnp.float32(1e-5))
        out = jnp.dot(normed.astype(w_ref.dtype), w_ref[...],
                      preferred_element_type=jnp.float32) + b_ref[...]
        o_ref[...] = out.astype(o_ref.dtype)


def _round_up(v, m):
    return ((v + m - 1) // m) * m


def _vmem_caps():
    """Generation-aware (scoped vmem cap, x-stream budget) in bytes."""
    phys = 64 * _MiB  # conservative fallback (v7x per-TC VMEM)
    try:
        info = pltpu.get_tpu_info()
        phys = int(getattr(info, "vmem_capacity_bytes", phys)) or phys
    except Exception:
        pass
    # Leave headroom for compiler-internal scratch: ~40 MiB cap on v7x (64 MiB
    # physical), ~96 MiB on v5e/v6e (128 MiB physical).
    cap = max(16 * _MiB, min(phys - 24 * _MiB, int(phys * 0.75)))
    stream_budget = 28 * _MiB if phys <= 64 * _MiB else 56 * _MiB
    return cap, stream_budget


def _choose_tiles(B, N, E, itemsize, stream_budget):
    # Sublane packing: 8 rows for 4-byte, 16 for 2-byte, 32 for 1-byte dtypes.
    sub = max(8, 32 // itemsize)

    # Batch tile: large (fewer grid steps, MXU-height finalize, dense stores),
    # but keep >= 2 batch tiles whenever B allows so the "parallel" batch axis
    # feeds both TensorCores on v7x.
    if B <= sub:
        tB = B
    else:
        tB = min(128, _round_up(pl.cdiv(B, 2), sub))

    def max_tok(tb):
        return stream_budget // (2 * tb * E * itemsize)

    # Rebalance: shrink the batch tile if the double-buffered x stream would not
    # leave room for a useful token tile.
    while tB > sub and max_tok(tB) < sub:
        tB = max(sub, _round_up(tB // 2, sub))

    mt = max(1, max_tok(tB))
    if mt >= N or N <= 8:
        tN = N                          # full token extent: always a legal block dim
    else:
        step = sub if mt >= sub else 8  # (8,128) constraint; prefer packed rounding
        tN = max(8, (min(mt, N) // step) * step)
    return tB, tN


def classification_head(x, gamma, beta, weight, bias, *, tok_tile=None, batch_tile=None):
    """x: (B, N, E). weight: (n_classes, E) as in nn.Linear. Returns (B, n_classes)."""
    B, N, E = x.shape
    C = weight.shape[0]
    assert N >= 2, "need at least 2 tokens (last token is dropped)"
    n_valid = N - 1

    itemsize = jnp.dtype(x.dtype).itemsize
    cap, stream_budget = _vmem_caps()
    tB, tN = _choose_tiles(B, N, E, itemsize, stream_budget)
    if batch_tile is not None:
        tB = batch_tile
    if tok_tile is not None:
        tN = tok_tile

    # Lane-dense / MXU-aligned output: pad classes to a multiple of 128.
    Cpad = _round_up(C, 128)

    # Fold the LayerNorm affine into the linear (algebraically exact):
    #   out = (normed * gamma + beta) @ W^T + b
    #       = normed @ (diag(gamma) @ W^T) + (beta @ W^T + b)
    w_fold = gamma.astype(jnp.float32)[:, None] * weight.T.astype(jnp.float32)   # (E, C)
    b_fold = beta.astype(jnp.float32) @ weight.T.astype(jnp.float32) + bias.astype(jnp.float32)
    w_pad = jnp.zeros((E, Cpad), dtype=x.dtype).at[:, :C].set(w_fold.astype(x.dtype))
    b_pad = jnp.zeros((1, Cpad), dtype=jnp.float32).at[0, :C].set(b_fold)

    # Stream only the tiles that contain kept tokens (never an all-dead tile).
    grid = (pl.cdiv(B, tB), pl.cdiv(n_valid, tN))

    # VMEM accounting with headroom, capped generation-aware.
    x_stream = 2 * tB * tN * E * itemsize
    resident = E * Cpad * itemsize + Cpad * 4
    scratch_b = tB * E * 4
    out_b = 2 * tB * Cpad * itemsize
    need = x_stream + resident + scratch_b + out_b
    vmem_limit = int(min(cap, max(16 * _MiB, 2 * need)))
    # TODO(synk): if E*Cpad alone approaches the per-generation cap (very large
    # class counts), tile the class dim of W' (extra grid axis) instead of a
    # single resident block.

    kernel = functools.partial(_head_kernel, n_valid=n_valid, tok_tile=tN)

    out_pad = pl.pallas_call(
        kernel,
        out_shape=jax.ShapeDtypeStruct((B, Cpad), x.dtype),
        grid_spec=pltpu.PrefetchScalarGridSpec(
            num_scalar_prefetch=0,
            grid=grid,
            in_specs=[
                pl.BlockSpec((tB, tN, E), lambda b, k: (b, k, 0)),   # streamed x
                pl.BlockSpec((E, Cpad), lambda b, k: (0, 0)),        # W' (resident)
                pl.BlockSpec((1, Cpad), lambda b, k: (0, 0)),        # b' (resident)
            ],
            out_specs=pl.BlockSpec((tB, Cpad), lambda b, k: (b, 0)),
            scratch_shapes=[pltpu.VMEM((tB, E), jnp.float32)],
        ),
        compiler_params=pltpu.CompilerParams(
            dimension_semantics=("parallel", "arbitrary"),
            vmem_limit_bytes=vmem_limit,
        ),
    )(x, w_pad, b_pad)

    return out_pad[:, :C]


def _reference(x, gamma, beta, weight, bias):
    pooled = jnp.mean(x[:, :-1, :].astype(jnp.float32), axis=1)
    mu = jnp.mean(pooled, axis=-1, keepdims=True)
    var = jnp.mean((pooled - mu) ** 2, axis=-1, keepdims=True)
    normed = (pooled - mu) / jnp.sqrt(var + 1e-5)
    y = normed * gamma.astype(jnp.float32) + beta.astype(jnp.float32)
    return (y @ weight.T.astype(jnp.float32) + bias.astype(jnp.float32)).astype(x.dtype)


if __name__ == "__main__":
    B, N, E, C = 2, 8, 32, 4  # batch, seq (incl. the dropped last token), emb_size, n_classes

    key = jax.random.PRNGKey(0)
    kx, kg, kb, kw, kbias = jax.random.split(key, 5)

    x = jax.random.normal(kx, (B, N, E), dtype=jnp.float32)
    # Deterministic synthetic parameters (not a checkpoint load).
    gamma = jnp.ones((E,), dtype=jnp.float32) + 0.01 * jax.random.normal(kg, (E,), dtype=jnp.float32)
    beta = 0.01 * jax.random.normal(kb, (E,), dtype=jnp.float32)
    weight = 0.1 * jax.random.normal(kw, (C, E), dtype=jnp.float32)   # nn.Linear weight shape
    bias = 0.01 * jax.random.normal(kbias, (C,), dtype=jnp.float32)

    head = jax.jit(classification_head)   # hoists the fold/pad prep into the same program
    out = jax.block_until_ready(head(x, gamma, beta, weight, bias))

    ref = _reference(x, gamma, beta, weight, bias)
    assert out.shape == (B, C)
    assert jnp.allclose(out, ref, atol=1e-4, rtol=1e-4), "mismatch vs reference"

    print("KERNEL_OK")
</pallas_src>

<mosaic_0001>
module attributes {stable_mosaic.version = 11 : i64} {
  func.func @_head_kernel(%arg0: i32, %arg1: i32, %arg2: memref<2x8x32xf32, #tpu.memory_space<vmem>>, %arg3: memref<32x128xf32, #tpu.memory_space<vmem>>, %arg4: memref<1x128xf32, #tpu.memory_space<vmem>>, %arg5: memref<2x128xf32, #tpu.memory_space<vmem>>, %arg6: memref<2x32xf32, #tpu.memory_space<vmem>>) attributes {dimension_semantics = [#tpu.dimension_semantics<parallel>, #tpu.dimension_semantics<arbitrary>], iteration_bounds = array<i64: 1, 1>, scalar_prefetch = 0 : i64, scratch_operands = 1 : i64, tpu.core_type = #tpu.core_type<tc>, window_params = [{transform_indices = @transform_0, window_bounds = array<i64: 2, 8, 32>}, {pipeline_mode = #tpu.pipeline_mode<synchronous>, transform_indices = @transform_1, window_bounds = array<i64: 32, 128>}, {pipeline_mode = #tpu.pipeline_mode<synchronous>, transform_indices = @transform_2, window_bounds = array<i64: 1, 128>}, {transform_indices = @transform_3, window_bounds = array<i64: 2, 128>}]} {
    %c8_i32 = arith.constant 8 : i32
    %0 = arith.muli %arg1, %c8_i32 : i32
    %c0_i32 = arith.constant 0 : i32
    %1 = arith.cmpi eq, %arg1, %c0_i32 : i32
    %2 = arith.extui %1 : i1 to i32
    %c0_i32_0 = arith.constant 0 : i32
    %3 = arith.cmpi ne, %2, %c0_i32_0 : i32
    scf.if %3 {
      %cst = arith.constant 0.000000e+00 : f32
      %15 = vector.broadcast %cst : f32 to vector<2x32xf32>
      %c0 = arith.constant 0 : index
      %c0_8 = arith.constant 0 : index
      %16 = vector.load %arg6[%c0, %c0_8] : memref<2x32xf32, #tpu.memory_space<vmem>>, vector<2x32xf32>
      tpu.vector_store %arg6[%c0, %c0_8], %15 {strides = array<i32>} : memref<2x32xf32, #tpu.memory_space<vmem>>, vector<2x32xf32>,
    } else {
    }
    %c8_i32_1 = arith.constant 8 : i32
    %4 = arith.addi %0, %c8_i32_1 : i32
    %c7_i32 = arith.constant 7 : i32
    %5 = arith.cmpi sle, %4, %c7_i32 : i32
    %6 = arith.extui %5 : i1 to i32
    %c0_i32_2 = arith.constant 0 : i32
    %7 = arith.cmpi ne, %6, %c0_i32_2 : i32
    scf.if %7 {
      %c0 = arith.constant 0 : index
      %c0_8 = arith.constant 0 : index
      %15 = vector.load %arg6[%c0, %c0_8] : memref<2x32xf32, #tpu.memory_space<vmem>>, vector<2x32xf32>
      %c0_9 = arith.constant 0 : index
      %c0_10 = arith.constant 0 : index
      %c0_11 = arith.constant 0 : index
      %16 = vector.load %arg2[%c0_9, %c0_10, %c0_11] : memref<2x8x32xf32, #tpu.memory_space<vmem>>, vector<2x8x32xf32>
      %cst = arith.constant dense<0.000000e+00> : vector<2x32xf32>
      %17 = vector.multi_reduction <add>, %16, %cst [1] : vector<2x8x32xf32> to vector<2x32xf32>
      %18 = arith.addf %15, %17 : vector<2x32xf32>
      %c0_12 = arith.constant 0 : index
      %c0_13 = arith.constant 0 : index
      %19 = vector.load %arg6[%c0_12, %c0_13] : memref<2x32xf32, #tpu.memory_space<vmem>>, vector<2x32xf32>
      tpu.vector_store %arg6[%c0_12, %c0_13], %18 {strides = array<i32>} : memref<2x32xf32, #tpu.memory_space<vmem>>, vector<2x32xf32>,
    } else {
    }
    %c8_i32_3 = arith.constant 8 : i32
    %8 = arith.addi %0, %c8_i32_3 : i32
    %c7_i32_4 = arith.constant 7 : i32
    %9 = arith.cmpi sgt, %8, %c7_i32_4 : i32
    %10 = arith.extui %9 : i1 to i32
    %c0_i32_5 = arith.constant 0 : i32
    %11 = arith.cmpi ne, %10, %c0_i32_5 : i32
    scf.if %11 {
      %c0 = arith.constant 0 : index
      %c0_8 = arith.constant 0 : index
      %c0_9 = arith.constant 0 : index
      %15 = vector.load %arg2[%c0, %c0_8, %c0_9] : memref<2x8x32xf32, #tpu.memory_space<vmem>>, vector<2x8x32xf32>
      %16 = tpu.iota {dimensions = array<i32: 0>} : vector<8x1xi32>
      %17 = vector.broadcast %0 : i32 to vector<8x1xi32>
      %18 = arith.addi %17, %16 : vector<8x1xi32>
      %c7_i32_10 = arith.constant 7 : i32
      %19 = vector.broadcast %c7_i32_10 : i32 to vector<8x1xi32>
      %20 = arith.cmpi slt, %18, %19 : vector<8x1xi32>
      %21 = vector.shape_cast %20 : vector<8x1xi1> to vector<1x8x1xi1>
      %cst = arith.constant 0.000000e+00 : f32
      %22 = vector.broadcast %cst : f32 to vector<2x8x32xf32>
      %23 = vector.shape_cast %21 : vector<1x8x1xi1> to vector<1x8x1xi1>
      %24 = vector.broadcast %23 : vector<1x8x1xi1> to vector<2x8x32xi1>
      %25 = arith.select %24, %15, %22 : vector<2x8x32xi1>, vector<2x8x32xf32>
      %c0_11 = arith.constant 0 : index
      %c0_12 = arith.constant 0 : index
      %26 = vector.load %arg6[%c0_11, %c0_12] : memref<2x32xf32, #tpu.memory_space<vmem>>, vector<2x32xf32>
      %cst_13 = arith.constant dense<0.000000e+00> : vector<2x32xf32>
      %27 = vector.multi_reduction <add>, %25, %cst_13 [1] : vector<2x8x32xf32> to vector<2x32xf32>
      %28 = arith.addf %26, %27 : vector<2x32xf32>
      %c0_14 = arith.constant 0 : index
      %c0_15 = arith.constant 0 : index
      %29 = vector.load %arg6[%c0_14, %c0_15] : memref<2x32xf32, #tpu.memory_space<vmem>>, vector<2x32xf32>
      tpu.vector_store %arg6[%c0_14, %c0_15], %28 {strides = array<i32>} : memref<2x32xf32, #tpu.memory_space<vmem>>, vector<2x32xf32>,
    } else {
    }
    %c0_i32_6 = arith.constant 0 : i32
    %12 = arith.cmpi eq, %arg1, %c0_i32_6 : i32
    %13 = arith.extui %12 : i1 to i32
    %c0_i32_7 = arith.constant 0 : i32
    %14 = arith.cmpi ne, %13, %c0_i32_7 : i32
    scf.if %14 {
      %c0 = arith.constant 0 : index
      %c0_8 = arith.constant 0 : index
      %15 = vector.load %arg6[%c0, %c0_8] : memref<2x32xf32, #tpu.memory_space<vmem>>, vector<2x32xf32>
      %cst = arith.constant 0.142857149 : f32
      %16 = vector.broadcast %cst : f32 to vector<2x32xf32>
      %17 = arith.mulf %15, %16 : vector<2x32xf32>
      %cst_9 = arith.constant dense<0.000000e+00> : vector<2xf32>
      %18 = vector.multi_reduction <add>, %17, %cst_9 [1] : vector<2x32xf32> to vector<2xf32>
      %19 = vector.shape_cast %18 : vector<2xf32> to vector<2x1xf32>
      %cst_10 = arith.constant 3.200000e+01 : f32
      %20 = vector.broadcast %cst_10 : f32 to vector<2x1xf32>
      %21 = arith.divf %19, %20 : vector<2x1xf32>
      %22 = vector.broadcast %21 : vector<2x1xf32> to vector<2x32xf32>
      %23 = arith.subf %17, %22 : vector<2x32xf32>
      %24 = arith.mulf %23, %23 : vector<2x32xf32>
      %cst_11 = arith.constant dense<0.000000e+00> : vector<2xf32>
      %25 = vector.multi_reduction <add>, %24, %cst_11 [1] : vector<2x32xf32> to vector<2xf32>
      %26 = vector.shape_cast %25 : vector<2xf32> to vector<2x1xf32>
      %cst_12 = arith.constant 3.200000e+01 : f32
      %27 = vector.broadcast %cst_12 : f32 to vector<2x1xf32>
      %28 = arith.divf %26, %27 : vector<2x1xf32>
      %29 = vector.broadcast %21 : vector<2x1xf32> to vector<2x32xf32>
      %30 = arith.subf %17, %29 : vector<2x32xf32>
      %cst_13 = arith.constant 9.99999974E-6 : f32
      %31 = vector.broadcast %cst_13 : f32 to vector<2x1xf32>
      %32 = arith.addf %28, %31 : vector<2x1xf32>
      %33 = math.rsqrt %32 : vector<2x1xf32>
      %34 = vector.broadcast %33 : vector<2x1xf32> to vector<2x32xf32>
      %35 = arith.mulf %30, %34 : vector<2x32xf32>
      %c0_14 = arith.constant 0 : index
      %c0_15 = arith.constant 0 : index
      %36 = vector.load %arg3[%c0_14, %c0_15] : memref<32x128xf32, #tpu.memory_space<vmem>>, vector<32x128xf32>
      %cst_16 = arith.constant dense<0.000000e+00> : vector<2x128xf32>
      %37 = tpu.matmul %35, %36, %cst_16 {dimension_numbers = #tpu.dot_dimension_numbers<[1], [0], [0], [1], [0, 0, 1, 1], [], []>} : vector<2x32xf32>, vector<32x128xf32>, vector<2x128xf32> -> vector<2x128xf32>
      %c0_17 = arith.constant 0 : index
      %c0_18 = arith.constant 0 : index
      %38 = vector.load %arg4[%c0_17, %c0_18] : memref<1x128xf32, #tpu.memory_space<vmem>>, vector<1x128xf32>
      %39 = vector.broadcast %38 : vector<1x128xf32> to vector<2x128xf32>
      %40 = arith.addf %37, %39 : vector<2x128xf32>
      %c0_19 = arith.constant 0 : index
      %c0_20 = arith.constant 0 : index
      %41 = vector.load %arg5[%c0_19, %c0_20] : memref<2x128xf32, #tpu.memory_space<vmem>>, vector<2x128xf32>
      tpu.vector_store %arg5[%c0_19, %c0_20], %40 {strides = array<i32>} : memref<2x128xf32, #tpu.memory_space<vmem>>, vector<2x128xf32>,
    } else {
    }
    return
  }
  func.func @transform_0(%arg0: i32, %arg1: i32) -> (i32, i32, i32) {
    %c0_i32 = arith.constant 0 : i32
    %c0_i32_0 = arith.constant 0 : i32
    return %arg0, %arg1, %c0_i32 : i32, i32, i32
  }
  func.func @transform_1(%arg0: i32, %arg1: i32) -> (i32, i32) {
    %c0_i32 = arith.constant 0 : i32
    %c0_i32_0 = arith.constant 0 : i32
    %c0_i32_1 = arith.constant 0 : i32
    return %c0_i32, %c0_i32_0 : i32, i32
  }
  func.func @transform_2(%arg0: i32, %arg1: i32) -> (i32, i32) {
    %c0_i32 = arith.constant 0 : i32
    %c0_i32_0 = arith.constant 0 : i32
    %c0_i32_1 = arith.constant 0 : i32
    return %c0_i32, %c0_i32_0 : i32, i32
  }
  func.func @transform_3(%arg0: i32, %arg1: i32) -> (i32, i32) {
    %c0_i32 = arith.constant 0 : i32
    %c0_i32_0 = arith.constant 0 : i32
    return %arg0, %c0_i32 : i32, i32
  }
}

</mosaic_0001>

<bundles_post_ra>
// kernel: classification_head.1
= control target key start
LH: loop header
LB: loop body
LE: loop exit
PB: predicated region body
PF: predicated region fallthrough
CT: control target
= control target key end

     0   :  { %vm20_vm0 = vcmask 254976   ;;  %v59_v0 = vlaneseq  ;;  %v266_v1 = vmov 0.0   ;;  %s330_s0 = inlined_call_operand.vmem [shape: f32[2,8,32], index: 0, kind: input, shape index: {}]   ;;  %s331_s1 = inlined_call_operand.vmem [shape: f32[32,128], index: 1, kind: input, shape index: {}]   ;;  %s332_s2 = inlined_call_operand.vmem [shape: f32[1,128], index: 2, kind: input, shape index: {}]   ;;  %s333_s3 = inlined_call_operand.hbm [shape: f32[2,128], index: 3, kind: output, shape index: {}]  }
   0x1   :  { %21 = vst.msk [vmem:[#allocation2] sm:$0x3] %vm20_vm0, %v266_v1 }
   0x2   :  { %8 = vsyncpa [#allocation4], 0  ;;  %v57_v2 = vld [vmem:[%s330_s0] sm:$0xff]  ;;  %v58_v3 = vld [vmem:[%s330_s0 + $0x8] sm:$0xff]  ;;  %v60_v4 = vshrl.u32 %v59_v0, 7  ;;  %vm69_vm1 = vcmask 261120  }
   0x3   :  { %vm86_vm3 = vcmask 1041409   ;;  %v112_v32 = vld [vmem:[%s331_s1] sm:$0xff]  ;;  %v113_v33 = vld [vmem:[%s331_s1 + $0x8] sm:$0xff]  ;;  %v114_v34 = vld [vmem:[%s331_s1 + $0x10] sm:$0xff]  ;;  %v267_v35 = vmov 0.0|0.0   ;;  %vm268_vm4 = vmmov 0  }
   0x4   :  { %vm63_vm2 = vcmp.lt.s32.totalorder %v60_v4, 7  ;;  %230 = vmatprep.subr.bf16.mxu0 %v267_v35  ;;  %v231_v36 = vpack.c.bf16 %v113_v33, %v112_v32  ;;  %v115_v37 = vld [vmem:[%s331_s1 + $0x18] sm:$0xff]  ;;  %227 = vmatprep.mubr.msk.f32.mxu0 %vm268_vm4, %v266_v1  ;;  %v212_v44 = vld [vmem:[%s332_s2] ss:$0 sm:$0xff]  ;;  %s269_s25 = smov [#allocation3]  }
   0x5   :  { %v66_v5 = vsel %vm63_vm2, %v57_v2, 0.0  ;;  %v67_v6 = vsel %vm63_vm2, %v58_v3, 0.0  ;;  %v234_v38 = vpack.c.bf16 %v115_v37, %v114_v34  ;;  %s204_s1 = sshll.u32 %s269_s25, 4  ;;  %s205_s1 = int_to_ptr.vmem [resolvable:$true] %s204_s1 }
   0x6   :  { %v70_v7 = vsel %vm69_vm1, %v66_v5, 0.0  ;;  %v77_v8 = vsel %vm69_vm1, %v67_v6, 0.0  ;;  %232 = vmatpush3.bf16.msra.mxu0 %v231_v36  ;;  %s242_s26 = scalar_lea.vmem %s205_s1, 32  ;;  %p247_p1 = scmp.lt.s32.totalorder %s205_s1, %s205_s1 }
   0x7   :  { %v71_v9 = vrot.slane %v70_v7, 4  ;;  %v78_v10 = vrot.slane %v77_v8, 4  ;;  %233 = vmatprep.subr.bf16.mxu0 %v267_v35  ;;  %p243_p0 = scmp.ne.s32.totalorder %s205_s1, %s242_s26  ;;  %p248_p2 = scmp.lt.s32.totalorder %s242_s26, %s242_s26 }
   0x8   :  { %v68_v19 = vld [vmem:[#allocation2] sm:$0x3] }
   0x9   :  { %v72_v11 = vadd.f32 %v71_v9, %v70_v7  ;;  %v79_v12 = vadd.f32 %v78_v10, %v77_v8  ;;  %p249_p3 = por %p248_p2, %p247_p1 }
   0xa   :  { %235 = vmatpush3.bf16.msra.mxu0 %v234_v38 }
   0xb   :  { %v73_v13 = vrot.slane %v72_v11, 2  ;;  %v80_v14 = vrot.slane %v79_v12, 2  ;;  %p250_p4 = pnand %p249_p3, %p243_p0 }
   0xd   :  { %v74_v15 = vadd.f32 %v73_v13, %v72_v11  ;;  %v81_v16 = vadd.f32 %v80_v14, %v79_v12 }
   0xf   :  { %v75_v17 = vrot.slane %v74_v15, 1  ;;  %v82_v18 = vrot.slane %v81_v16, 1 }
  0x11   :  { %v76_v20 = vadd.f32 %v75_v17, %v74_v15  ;;  %v83_v21 = vadd.f32 %v82_v18, %v81_v16 }
  0x13   :  { %v87_v22 = vsel %vm86_vm3, %v83_v21, %v76_v20 }
  0x14   :  { %v89_v23 = vadd.f32 %v87_v22, %v68_v19 }
  0x16   :  { %91 = vst.msk [vmem:[#allocation2] sm:$0x3] %vm20_vm0, %v89_v23 }
  0x1d   :  { %v95_v24 = vld [vmem:[#allocation2] sm:$0x3] }
  0x1e   :  { %v96_v25 = vmul.f32 0.14285715, %v95_v24 }
  0x20   :  { %v98_v26 = vsel %vm20_vm0, %v96_v25, 0.0 }
  0x21   :  { %99 = vadd.xlane.f32.xlu0 %v98_v26 }
  0xae   :  { %v100_v27 = vpop.xlane.xlu0 %99 }
  0xaf   :  { %v102_v28 = vmul.f32 0.03125, %v100_v27 }
  0xb1   :  { %v103_v29 = vsub.f32 %v96_v25, %v102_v28 }
  0xb3   :  { %v104_v30 = vmul.f32 %v103_v29, %v103_v29 }
  0xb5   :  { %v105_v31 = vsel %vm20_vm0, %v104_v30, 0.0 }
  0xb6   :  { %106 = vadd.xlane.f32.xlu0 %v105_v31 }
 0x143   :  { %v107_v39 = vpop.xlane.xlu0 %106 }
 0x144   :  { %v108_v40 = vmul.f32 0.03125, %v107_v39 }
 0x146   :  { %v109_v41 = vadd.f32 1e-05, %v108_v40 }
 0x148   :  { %240 = vrsqrt.f32 %v109_v41 }
 0x152   :  { %v241_v42 = vpop.eup %240 }
 0x153   :  { %v111_v43 = vmul.f32 %v241_v42, %v103_v29 }
 0x155   :  { %228 = vmatmul.mubr.msk.f32.vlgmr.msra.gmra.mrb[0].mxu0 %vm69_vm1, %v111_v43 }
 0x228   :  { %v193_v45 = vpop.f32.mrb[0].mxu0 }
 0x229   :  { %v194_v46 = vadd.f32 %v212_v44, %v193_v45  ;;  %v229_v47 = vpop.f32.mrb[1].mxu0 }
 0x22b   :  { %197 = vst [vmem:[#allocation3] sm:$0x3] %v194_v46 }
 0x22c   :  { %253 = shalt.err (!%p250_p4)
}
 0x22d   :  { %s254_s29 = scalar_lea.hbm %s333_s3, 32 }
 0x22e   :  { %p255_p5 = scmp.ne.s32.totalorder %s333_s3, %s254_s29  ;;  %p258_p6 = scmp.lt.u32.totalorder %s254_s29, %s333_s3 }
 0x230   :  { %p260_p7 = pnand %p258_p6, %p255_p5 }
 0x232   :  { %263 = shalt.err (!%p260_p7)
}
 0x233   :  { %207 = dma.vmem_to_hbm [thread:$0]  %s205_s1, 32, %s333_s3, [#allocation4]  }
 0x234   :  { %264 = dma.done.wait [#allocation4], 32  }
 0x235   :  { %265 = vsyncadd [#allocation4], 4294967264 }
 0x236   :  { %211 = vsyncpa [#allocation4], 1 }

</bundles_post_ra>
